<compile_context>
chip_gen: v7x
topology: tpu7x:2x2x1
jax: 0.10.0
libtpu: 0.0.40
codegen_flags: <defaults>
</compile_context>

<pallas_src>
import jax
import jax.numpy as jnp
from jax.experimental import pallas as pl
from jax.experimental.pallas import tpu as pltpu


def nw_kernel(w_ref, q_ref, k_ref, v_ref, o_ref):
    # w_ref: (1,1) scalar in SMEM
    # q_ref: (tile_n, 1), k_ref/v_ref: (tile_n, m) in VMEM
    # o_ref: (1, 1, tile_n) lane-dense output block in VMEM
    w = w_ref[0, 0]
    c = -0.5 * w * w                           # fold -((.)*w)^2/2 into one scalar

    q = q_ref[...].astype(jnp.float32)         # (tile_n, 1)
    k = k_ref[...].astype(jnp.float32)         # (tile_n, m)
    v = v_ref[...].astype(jnp.float32)         # (tile_n, m)

    d = q - k                                  # broadcast (tile_n,1)-(tile_n,m)
    s = c * (d * d)                            # scores, (tile_n, m)

    # Numerically-stable softmax fused with the value reduction:
    #   out = sum(e*v) / sum(e),  e = exp(s - max(s))
    s_max = jnp.max(s, axis=1, keepdims=True)
    e = jnp.exp(s - s_max)                     # unnormalized weights
    num = jnp.sum(e * v, axis=1, keepdims=True)    # (tile_n, 1)
    den = jnp.sum(e, axis=1, keepdims=True)        # (tile_n, 1)
    out = num * pl.reciprocal(den, approx=False)   # exact: keeps 1e-5 parity

    # Re-layout the (tile_n, 1) column to a lane-dense row (XLU, off the
    # store critical path), then store a full unmasked block.
    o_ref[...] = out.reshape(o_ref.shape).astype(o_ref.dtype)


def _round_up(x, k):
    return ((x + k - 1) // k) * k


def _choose_tile_n(n, m, itemsize):
    # Per-step VMEM footprint estimate:
    #   inputs : keys + values, double-buffered -> 2 tensors * 2 bufs * tile*m*itemsize
    #   temps  : ~4 live f32 (tile, m) intermediates (d/s, e, e*v, f32 upcasts)
    bytes_per_row = m * (4 * itemsize + 4 * 4)
    budget = 12 << 20            # keeps the total well inside v7x's 64 MiB VMEM
    tile = budget // bytes_per_row
    tile = max(8, min(1024, (tile // 8) * 8))
    # Keep >= ~8 grid steps (DMA/compute pipelining + both v7x TensorCores),
    # but never shred tiny problems below 64-row tiles just to make steps.
    min_steps = 8
    cap = max(64, _round_up(pl.cdiv(n, min_steps), 8))
    tile = min(tile, cap)
    return min(tile, _round_up(n, 8))


def nw_kernel_regression(queries, keys, values, w, tile_n=None):
    """queries: (n,), keys/values: (n, m), w: scalar -> (n,)"""
    n, m = keys.shape
    itemsize = max(jnp.dtype(keys.dtype).itemsize, jnp.dtype(values.dtype).itemsize)
    if tile_n is None:
        tile_n = _choose_tile_n(n, m, itemsize)
    tile_n = max(8, (int(tile_n) // 8) * 8)
    tile_n = min(tile_n, _round_up(n, 8))
    num_tiles = pl.cdiv(n, tile_n)

    # Native-dtype DMA; no padding of keys/values (ragged last block is fine:
    # rows are independent and the surplus rows are sliced off below).
    q2 = queries.reshape(n, 1)
    w2 = jnp.asarray(w, jnp.float32).reshape(1, 1)

    out_dtype = values.dtype
    k_item = jnp.dtype(keys.dtype).itemsize
    v_item = jnp.dtype(values.dtype).itemsize
    cost = pl.CostEstimate(
        flops=6 * n * m,
        transcendentals=n * m,
        bytes_accessed=n * m * (k_item + v_item)
        + n * (jnp.dtype(queries.dtype).itemsize + jnp.dtype(out_dtype).itemsize),
    )

    # Explicit scoped-VMEM limit: double-buffered k/v blocks + f32 temps + slack.
    vmem_est = tile_n * m * (4 * itemsize + 4 * 4) + (4 << 20)
    vmem_limit = int(min(48 << 20, max(16 << 20, vmem_est)))

    out = pl.pallas_call(
        nw_kernel,
        out_shape=jax.ShapeDtypeStruct((num_tiles, 1, tile_n), out_dtype),
        grid=(num_tiles,),
        in_specs=[
            pl.BlockSpec(memory_space=pltpu.SMEM),               # w (scalar)
            pl.BlockSpec((tile_n, 1), lambda i: (i, 0)),          # queries
            pl.BlockSpec((tile_n, m), lambda i: (i, 0)),          # keys
            pl.BlockSpec((tile_n, m), lambda i: (i, 0)),          # values
        ],
        out_specs=pl.BlockSpec((1, 1, tile_n), lambda i: (i, 0, 0)),
        compiler_params=pltpu.CompilerParams(
            dimension_semantics=("parallel",),                    # megacore on v7x
            vmem_limit_bytes=vmem_limit,
        ),
        cost_estimate=cost,
    )(w2, q2, keys, values)
    return out.reshape(-1)[:n]


def nw_reference(queries, keys, values, w):
    """Pure-JAX reference mirroring the PyTorch forward."""
    n, m = keys.shape
    q_b = jnp.repeat(queries, m).reshape(n, m)
    s = -((q_b - keys) * w) ** 2 / 2.0
    attn = jax.nn.softmax(s, axis=1)
    return jnp.sum(attn * values, axis=1)


if __name__ == "__main__":
    # Deterministic parameter init, matching nn.Parameter(torch.tensor([0.1]))
    w = jnp.float32(0.1)

    key = jax.random.PRNGKey(0)
    k1, k2, k3, k4, k5, k6, k7, k8, k9 = jax.random.split(key, 9)

    # Case 1: classic d2l-style shapes (n=50 queries, 50 key/value pairs each).
    n1, m1 = 50, 50
    q_a = jax.random.uniform(k1, (n1,), dtype=jnp.float32) * 5.0
    keys_a = jax.random.uniform(k2, (n1, m1), dtype=jnp.float32) * 5.0
    vals_a = jax.random.normal(k3, (n1, m1), dtype=jnp.float32)

    out_a = jax.block_until_ready(nw_kernel_regression(q_a, keys_a, vals_a, w))
    ref_a = nw_reference(q_a, keys_a, vals_a, w)
    assert out_a.shape == (n1,)
    assert jnp.allclose(out_a, ref_a, atol=1e-5, rtol=1e-5), (out_a, ref_a)

    # Case 2: non-aligned n -> multi-tile grid with a ragged last block (no pad).
    n2, m2 = 1000, 96
    q_b = jax.random.uniform(k4, (n2,), dtype=jnp.float32) * 5.0
    keys_b = jax.random.uniform(k5, (n2, m2), dtype=jnp.float32) * 5.0
    vals_b = jax.random.normal(k6, (n2, m2), dtype=jnp.float32)

    out_b = jax.block_until_ready(nw_kernel_regression(q_b, keys_b, vals_b, w))
    ref_b = nw_reference(q_b, keys_b, vals_b, w)
    assert out_b.shape == (n2,)
    assert jnp.allclose(out_b, ref_b, atol=1e-5, rtol=1e-5), (out_b, ref_b)

    # Case 3: larger aligned problem with an explicit tile override (grid=(4,)).
    n3, m3 = 1024, 256
    q_c = jax.random.uniform(k7, (n3,), dtype=jnp.float32) * 5.0
    keys_c = jax.random.uniform(k8, (n3, m3), dtype=jnp.float32) * 5.0
    vals_c = jax.random.normal(k9, (n3, m3), dtype=jnp.float32)

    out_c = jax.block_until_ready(
        nw_kernel_regression(q_c, keys_c, vals_c, w, tile_n=256)
    )
    ref_c = nw_reference(q_c, keys_c, vals_c, w)
    assert out_c.shape == (n3,)
    assert jnp.allclose(out_c, ref_c, atol=1e-5, rtol=1e-5), (out_c, ref_c)

    print("KERNEL_OK")
</pallas_src>

<mosaic_0001>
module attributes {stable_mosaic.version = 11 : i64} {
  func.func @nw_kernel(%arg0: i32, %arg1: memref<1x1xf32, #tpu.memory_space<smem>>, %arg2: memref<56x1xf32, #tpu.memory_space<vmem>>, %arg3: memref<56x50xf32, #tpu.memory_space<vmem>>, %arg4: memref<56x50xf32, #tpu.memory_space<vmem>>, %arg5: memref<1x1x56xf32, #tpu.memory_space<vmem>>) attributes {dimension_semantics = [#tpu.dimension_semantics<parallel>], iteration_bounds = array<i64: 1>, scalar_prefetch = 0 : i64, scratch_operands = 0 : i64, tpu.core_type = #tpu.core_type<tc>, window_params = [{transform_indices = @transform_0, window_bounds = array<i64: 1, 1>}, {transform_indices = @transform_1, window_bounds = array<i64: 56, 1>}, {transform_indices = @transform_2, window_bounds = array<i64: 56, 50>}, {transform_indices = @transform_3, window_bounds = array<i64: 56, 50>}, {transform_indices = @transform_4, window_bounds = array<i64: 1, 1, 56>}]} {
    %c0 = arith.constant 0 : index
    %c0_0 = arith.constant 0 : index
    %0 = memref.load %arg1[%c0, %c0_0] : memref<1x1xf32, #tpu.memory_space<smem>>
    %cst = arith.constant -5.000000e-01 : f32
    %1 = arith.mulf %cst, %0 : f32
    %2 = arith.mulf %1, %0 : f32
    %c0_1 = arith.constant 0 : index
    %c0_2 = arith.constant 0 : index
    %3 = vector.load %arg2[%c0_1, %c0_2] : memref<56x1xf32, #tpu.memory_space<vmem>>, vector<56x1xf32>
    %c0_3 = arith.constant 0 : index
    %c0_4 = arith.constant 0 : index
    %4 = vector.load %arg3[%c0_3, %c0_4] : memref<56x50xf32, #tpu.memory_space<vmem>>, vector<56x50xf32>
    %c0_5 = arith.constant 0 : index
    %c0_6 = arith.constant 0 : index
    %5 = vector.load %arg4[%c0_5, %c0_6] : memref<56x50xf32, #tpu.memory_space<vmem>>, vector<56x50xf32>
    %6 = vector.broadcast %3 : vector<56x1xf32> to vector<56x50xf32>
    %7 = arith.subf %6, %4 : vector<56x50xf32>
    %8 = arith.mulf %7, %7 : vector<56x50xf32>
    %9 = vector.broadcast %2 : f32 to vector<56x50xf32>
    %10 = arith.mulf %9, %8 : vector<56x50xf32>
    %cst_7 = arith.constant dense<0xFF800000> : vector<56xf32>
    %11 = vector.multi_reduction <maximumf>, %10, %cst_7 [1] : vector<56x50xf32> to vector<56xf32>
    %12 = vector.shape_cast %11 : vector<56xf32> to vector<56x1xf32>
    %13 = vector.broadcast %12 : vector<56x1xf32> to vector<56x50xf32>
    %14 = arith.subf %10, %13 : vector<56x50xf32>
    %15 = math.exp %14 : vector<56x50xf32>
    %16 = arith.mulf %15, %5 : vector<56x50xf32>
    %cst_8 = arith.constant dense<0.000000e+00> : vector<56xf32>
    %17 = vector.multi_reduction <add>, %16, %cst_8 [1] : vector<56x50xf32> to vector<56xf32>
    %18 = vector.shape_cast %17 : vector<56xf32> to vector<56x1xf32>
    %cst_9 = arith.constant dense<0.000000e+00> : vector<56xf32>
    %19 = vector.multi_reduction <add>, %15, %cst_9 [1] : vector<56x50xf32> to vector<56xf32>
    %20 = vector.shape_cast %19 : vector<56xf32> to vector<56x1xf32>
    %21 = tpu.reciprocal %20 : vector<56x1xf32> -> vector<56x1xf32>
    %22 = arith.mulf %18, %21 : vector<56x1xf32>
    %23 = vector.shape_cast %22 : vector<56x1xf32> to vector<1x1x56xf32>
    %c0_10 = arith.constant 0 : index
    %c0_11 = arith.constant 0 : index
    %c0_12 = arith.constant 0 : index
    %24 = vector.load %arg5[%c0_10, %c0_11, %c0_12] : memref<1x1x56xf32, #tpu.memory_space<vmem>>, vector<1x1x56xf32>
    tpu.vector_store %arg5[%c0_10, %c0_11, %c0_12], %23 {strides = array<i32>} : memref<1x1x56xf32, #tpu.memory_space<vmem>>, vector<1x1x56xf32>,
    return
  }
  func.func @transform_0(%arg0: i32) -> (i32, i32) {
    %c0_i32 = arith.constant 0 : i32
    %c0_i32_0 = arith.constant 0 : i32
    %c0_i32_1 = arith.constant 0 : i32
    return %c0_i32, %c0_i32_0 : i32, i32
  }
  func.func @transform_1(%arg0: i32) -> (i32, i32) {
    %c0_i32 = arith.constant 0 : i32
    %c0_i32_0 = arith.constant 0 : i32
    return %arg0, %c0_i32 : i32, i32
  }
  func.func @transform_2(%arg0: i32) -> (i32, i32) {
    %c0_i32 = arith.constant 0 : i32
    %c0_i32_0 = arith.constant 0 : i32
    return %arg0, %c0_i32 : i32, i32
  }
  func.func @transform_3(%arg0: i32) -> (i32, i32) {
    %c0_i32 = arith.constant 0 : i32
    %c0_i32_0 = arith.constant 0 : i32
    return %arg0, %c0_i32 : i32, i32
  }
  func.func @transform_4(%arg0: i32) -> (i32, i32, i32) {
    %c0_i32 = arith.constant 0 : i32
    %c0_i32_0 = arith.constant 0 : i32
    %c0_i32_1 = arith.constant 0 : i32
    return %arg0, %c0_i32, %c0_i32_0 : i32, i32, i32
  }
}

</mosaic_0001>

<bundles_post_ra>
// kernel: tpu_custom_call.1
= control target key start
LH: loop header
LB: loop body
LE: loop exit
PB: predicated region body
PF: predicated region fallthrough
CT: control target
= control target key end

     0   :  { %10 = vsyncpa [#allocation4], 0  ;;  %s499_s0 = inlined_call_operand.<no memory space> [shape: f32[1,1], index: 0, kind: input, shape index: {}]   ;;  %s500_s1 = inlined_call_operand.vmem [shape: f32[50,1], index: 1, kind: input, shape index: {}]   ;;  %s501_s2 = inlined_call_operand.vmem [shape: f32[50,50], index: 2, kind: input, shape index: {}]   ;;  %s502_s3 = inlined_call_operand.hbm [shape: f32[50,50], index: 3, kind: input, shape index: {}]   ;;  %s503_s4 = inlined_call_operand.hbm [shape: f32[1,1,56], index: 4, kind: output, shape index: {}]  }
   0x1   :  { %11 = vsyncpa [#allocation5], 0  ;;  %s376_s15 = smov [#allocation3]   ;;  %s328_s19 = scalar_lea.hbm %s502_s3, 896 }
   0x2   :  { %s23_s16 = sshll.u32 %s376_s15, 4  ;;  %p329_p0 = scmp.ne.s32.totalorder %s502_s3, %s328_s19  ;;  %s24_s16 = int_to_ptr.vmem [resolvable:$true] %s23_s16 }
   0x3   :  { %p332_p1 = scmp.lt.u32.totalorder %s328_s19, %s502_s3 }
   0x5   :  { %p334_p2 = pnand %p332_p1, %p329_p0 }
   0x7   :  { %337 = shalt.err (!%p334_p2)
}
   0x8   :  { %s338_s24 = scalar_lea.vmem %s24_s16, 896  ;;  %p343_p4 = scmp.lt.s32.totalorder %s24_s16, %s24_s16 }
   0x9   :  { %p339_p3 = scmp.ne.s32.totalorder %s24_s16, %s338_s24  ;;  %p344_p5 = scmp.lt.s32.totalorder %s338_s24, %s338_s24 }
   0xb   :  { %p345_p6 = por %p344_p5, %p343_p4 }
   0xd   :  { %p346_p7 = pnand %p345_p6, %p339_p3 }
   0xf   :  { %349 = shalt.err (!%p346_p7)
}
  0x10   :  { %s377_s25 = smov 128   ;;  %s378_s26 = smov 8  }
  0x11   :  { %29 = dma.hbm_to_vmem [thread:$0]  %s502_s3, 896, %s24_s16, [#allocation4], %s377_s25, %s377_s25, %s378_s26  }
  0x12   :  { %372 = dma.done.wait [#allocation4], 896  }
  0x13   :  { %373 = vsyncadd [#allocation4], 4294966400  ;;  %v379_v0 = vmov 0   ;;  %v38_v1 = vld [vmem:[%s500_s1 + $0x10] sm:$0xff]  ;;  %v36_v2 = vld [vmem:[%s500_s1] sm:$0xff]  ;;  %s34_s18 = smul.f32 -0.5, %s499_s0 }
  0x14   :  { %299 = vset.pattern.permute.xlu1 %v379_v0  ;;  %298 = vset.pattern.permute.xlu0 %v379_v0  ;;  %v39_v3 = vld [vmem:[%s500_s1 + $0x18] sm:$0xff]  ;;  %v37_v4 = vld [vmem:[%s500_s1 + $0x8] sm:$0xff]  ;;  %v40_v6 = vld [vmem:[%s500_s1 + $0x20] sm:$0xff]  ;;  %vm114_vm0 = vcmask 408576   ;;  %vm238_vm1 = vcmask 130112   ;;  %vm245_vm2 = vcmask 195712  }
  0x15   :  { %69 = vperm.xlu1 %299, %v38_v1   ;;  %59 = vperm.xlu0 %298, %v36_v2   ;;  %v41_v5 = vld [vmem:[%s500_s1 + $0x28] sm:$0xff]  ;;  %v42_v7 = vld [vmem:[%s500_s1 + $0x30] sm:$0xff]  ;;  %v43_v8 = vld [vmem:[%s501_s2] sm:$0xff]  ;;  %s35_s23 = smul.f32 %s34_s18, %s499_s0  ;;  %vm252_vm3 = vcmask 261312   ;;  %vm259_vm4 = vcmask 326912   ;;  %vm266_vm5 = vcmask 392512  }
  0x16   :  { %v45_v9 = vld [vmem:[%s501_s2 + $0x10] sm:$0xff]  ;;  %v46_v14 = vld [vmem:[%s501_s2 + $0x18] sm:$0xff]  ;;  %v44_v15 = vld [vmem:[%s501_s2 + $0x8] sm:$0xff]  ;;  %vm273_vm6 = vcmask 458112   ;;  %vm276_vm7 = vcmask 450560  }
  0x17   :  { %v106_v16 = vstv %s35_s23  ;;  %v48_v24 = vld [vmem:[%s501_s2 + $0x28] sm:$0xff]  ;;  %v47_v25 = vld [vmem:[%s501_s2 + $0x20] sm:$0xff]  ;;  %v49_v35 = vld [vmem:[%s501_s2 + $0x30] sm:$0xff]  ;;  %s380_s2 = smov [#allocation6]  }
  0x18   :  { %s284_s8 = sshll.u32 %s380_s2, 4  ;;  %s285_s8 = int_to_ptr.vmem [resolvable:$true] %s284_s8 }
  0x19   :  { %74 = vperm.xlu1 %299, %v39_v3   ;;  %64 = vperm.xlu0 %298, %v37_v4   ;;  %s350_s3 = scalar_lea.vmem %s285_s8, 16  ;;  %s354_s9 = scalar_lea.vmem %s285_s8, 32 }
  0x1a   :  { %p351_p8 = scmp.ne.s32.totalorder %s285_s8, %s350_s3  ;;  %p355_p9 = scmp.lt.s32.totalorder %s285_s8, %s285_s8 }
  0x1b   :  { %p356_p10 = scmp.lt.s32.totalorder %s354_s9, %s350_s3 }
  0x1d   :  { %84 = vperm.xlu1 %299, %v41_v5   ;;  %79 = vperm.xlu0 %298, %v40_v6   ;;  %p357_p11 = por %p356_p10, %p355_p9 }
  0x1f   :  { %p358_p12 = pnand %p357_p11, %p351_p8 }
  0x21   :  { %89 = vperm.xlu0 %298, %v42_v7  }
  0x94   :  { %v70_v10 = vpop.permute.xlu1 %69  ;;  %v60_v11 = vpop.permute.xlu0 %59 }
  0x95   :  { %v92_v12 = vsub.f32 %v60_v11, %v43_v8  ;;  %v94_v13 = vsub.f32 %v70_v10, %v45_v9 }
  0x97   :  { %v99_v17 = vmul.f32 %v92_v12, %v92_v12  ;;  %v101_v23 = vmul.f32 %v94_v13, %v94_v13 }
  0x98   :  { %v75_v18 = vpop.permute.xlu1 %74  ;;  %v65_v19 = vpop.permute.xlu0 %64 }
  0x99   :  { %v95_v20 = vsub.f32 %v75_v18, %v46_v14  ;;  %v93_v21 = vsub.f32 %v65_v19, %v44_v15  ;;  %v107_v22 = vmul.f32 %v106_v16, %v99_v17  ;;  %v109_v36 = vmul.f32 %v106_v16, %v101_v23  ;;  %v50_v17 = vld [vmem:[#allocation3] sm:$0xff]  ;;  %v51_v23 = vld [vmem:[#allocation3 + $0x8] sm:$0xff] }
  0x9b   :  { %v102_v26 = vmul.f32 %v95_v20, %v95_v20  ;;  %v100_v27 = vmul.f32 %v93_v21, %v93_v21  ;;  %v115_v28 = vsel %vm114_vm0, %v107_v22, -inf  ;;  %v121_v46 = vsel %vm114_vm0, %v109_v36, -inf }
  0x9c   :  { %v85_v29 = vpop.permute.xlu1 %84  ;;  %116 = vmax.xlane.f32.xlu1 %v115_v28  ;;  %v80_v30 = vpop.permute.xlu0 %79 }
  0x9d   :  { %v97_v31 = vsub.f32 %v85_v29, %v48_v24  ;;  %v96_v32 = vsub.f32 %v80_v30, %v47_v25  ;;  %v110_v33 = vmul.f32 %v106_v16, %v102_v26  ;;  %v108_v34 = vmul.f32 %v106_v16, %v100_v27  ;;  %v54_v29 = vld [vmem:[#allocation3 + $0x20] sm:$0xff]  ;;  %v53_v30 = vld [vmem:[#allocation3 + $0x18] sm:$0xff] }
  0x9f   :  { %v104_v37 = vmul.f32 %v97_v31, %v97_v31  ;;  %v103_v38 = vmul.f32 %v96_v32, %v96_v32  ;;  %v124_v39 = vsel %vm114_vm0, %v110_v33, -inf  ;;  %v118_v40 = vsel %vm114_vm0, %v108_v34, -inf }
  0xa0   :  { %125 = vmax.xlane.f32.xlu1 %v124_v39  ;;  %119 = vmax.xlane.f32.xlu0 %v118_v40  ;;  %v90_v41 = vpop.permute.xlu0 %89 }
  0xa1   :  { %v98_v42 = vsub.f32 %v90_v41, %v49_v35  ;;  %v112_v43 = vmul.f32 %v106_v16, %v104_v37  ;;  %v111_v47 = vmul.f32 %v106_v16, %v103_v38  ;;  %v55_v35 = vld [vmem:[#allocation3 + $0x28] sm:$0xff] }
  0xa3   :  { %v105_v44 = vmul.f32 %v98_v42, %v98_v42  ;;  %v130_v45 = vsel %vm114_vm0, %v112_v43, -inf  ;;  %v127_v48 = vsel %vm114_vm0, %v111_v47, -inf }
  0xa4   :  { %131 = vmax.xlane.f32.xlu1 %v130_v45  ;;  %122 = vmax.xlane.f32.xlu0 %v121_v46 }
  0xa5   :  { %v113_v49 = vmul.f32 %v106_v16, %v105_v44 }
  0xa7   :  { %v133_v50 = vsel %vm114_vm0, %v113_v49, -inf }
  0xa8   :  { %128 = vmax.xlane.f32.xlu0 %v127_v48 }
  0xac   :  { %134 = vmax.xlane.f32.xlu0 %v133_v50 }
 0x129   :  { %v117_v51 = vpop.xlane.xlu1 %116 }
 0x12a   :  { %v136_v52 = vsub.f32 %v107_v22, %v117_v51  ;;  %v52_v22 = vld [vmem:[#allocation3 + $0x10] sm:$0xff] }
 0x12c   :  { %v143_v53 = vmul.f32 1.442695, %v136_v52 }
 0x12d   :  { %v126_v54 = vpop.xlane.xlu1 %125  ;;  %v120_v55 = vpop.xlane.xlu0 %119 }
 0x12e   :  { %300 = vpow2.f32 %v143_v53  ;;  %v139_v56 = vsub.f32 %v110_v33, %v126_v54  ;;  %v137_v57 = vsub.f32 %v108_v34, %v120_v55 }
 0x130   :  { %v145_v58 = vmul.f32 1.442695, %v137_v57  ;;  %v149_v59 = vmul.f32 1.442695, %v139_v56 }
 0x131   :  { %v132_v60 = vpop.xlane.xlu1 %131  ;;  %v123_v61 = vpop.xlane.xlu0 %122 }
 0x132   :  { %v141_v62 = vsub.f32 %v112_v43, %v132_v60  ;;  %v138_v63 = vsub.f32 %v109_v36, %v123_v61  ;;  %302 = vpow2.f32 %v145_v58  ;;  %v56_v36 = vld [vmem:[#allocation3 + $0x30] sm:$0xff] }
 0x133   :  { %304 = vpow2.f32 %v149_v59 }
 0x134   :  { %v147_v0 = vmul.f32 1.442695, %v138_v63  ;;  %v153_v1 = vmul.f32 1.442695, %v141_v62 }
 0x135   :  { %v129_v2 = vpop.xlane.xlu0 %128 }
 0x136   :  { %v140_v3 = vsub.f32 %v111_v47, %v129_v2  ;;  %306 = vpow2.f32 %v147_v0  ;;  %v227_v47 = vlaneseq }
 0x137   :  { %308 = vpow2.f32 %v153_v1 }
 0x138   :  { %v301_v4 = vpop.eup %300  ;;  %v151_v5 = vmul.f32 1.442695, %v140_v3  ;;  %v228_v50 = vand.u32 127, %v227_v47  ;;  %v230_v51 = vshrl.u32 %v227_v47, 7 }
 0x139   :  { %v135_v6 = vpop.xlane.xlu0 %134  ;;  %v185_v7 = vsel %vm114_vm0, %v301_v4, 0.0  ;;  %v157_v21 = vmul.f32 %v301_v4, %v50_v17 }
 0x13a   :  { %310 = vpow2.f32 %v151_v5  ;;  %v142_v8 = vsub.f32 %v113_v49, %v135_v6  ;;  %186 = vadd.xlane.f32.xlu1 %v185_v7  ;;  %v233_v52 = vadd.s32 4294967288, %v228_v50  ;;  %v240_v55 = vadd.s32 4294967280, %v228_v50 }
 0x13b   :  { %v164_v26 = vsel %vm114_vm0, %v157_v21, 0.0  ;;  %v247_v57 = vadd.s32 4294967272, %v228_v50  ;;  %v231_v59 = vsub.s32 %v228_v50, %v230_v51  ;;  %v254_v2 = vadd.s32 4294967264, %v228_v50 }
 0x13c   :  { %v155_v9 = vmul.f32 1.442695, %v142_v8  ;;  %v303_v10 = vpop.eup %302  ;;  %v236_v61 = vsub.s32 %v233_v52, %v230_v51  ;;  %v243_v0 = vsub.s32 %v240_v55, %v230_v51 }
 0x13d   :  { %v188_v11 = vsel %vm114_vm0, %v303_v10, 0.0  ;;  %v305_v12 = vpop.eup %304  ;;  %v158_v28 = vmul.f32 %v303_v10, %v51_v23  ;;  %v250_v5 = vsub.s32 %v247_v57, %v230_v51  ;;  %v268_v10 = vadd.s32 4294967248, %v228_v50 }
 0x13e   :  { %312 = vpow2.f32 %v155_v9  ;;  %189 = vadd.xlane.f32.xlu0 %v188_v11  ;;  %v194_v14 = vsel %vm114_vm0, %v305_v12, 0.0  ;;  %v160_v34 = vmul.f32 %v305_v12, %v53_v30  ;;  %v261_v9 = vadd.s32 4294967256, %v228_v50 }
 0x13f   :  { %v167_v32 = vsel %vm114_vm0, %v158_v28, 0.0 }
 0x140   :  { %v307_v13 = vpop.eup %306  ;;  %v173_v38 = vsel %vm114_vm0, %v160_v34, 0.0  ;;  %v264_v21 = vsub.s32 %v261_v9, %v230_v51 }
 0x141   :  { %v191_v15 = vsel %vm114_vm0, %v307_v13, 0.0  ;;  %v309_v16 = vpop.eup %308  ;;  %v159_v27 = vmul.f32 %v307_v13, %v52_v22  ;;  %v271_v22 = vsub.s32 %v268_v10, %v230_v51 }
 0x142   :  { %195 = vadd.xlane.f32.xlu0 %v194_v14  ;;  %192 = vadd.xlane.f32.xlu1 %v191_v15  ;;  %v200_v20 = vsel %vm114_vm0, %v309_v16, 0.0  ;;  %v162_v39 = vmul.f32 %v309_v16, %v55_v35  ;;  %v257_v14 = vsub.s32 %v254_v2, %v230_v51 }
 0x143   :  { %v170_v31 = vsel %vm114_vm0, %v159_v27, 0.0 }
 0x144   :  { %v311_v18 = vpop.eup %310  ;;  %v179_v41 = vsel %vm114_vm0, %v162_v39, 0.0 }
 0x145   :  { %v197_v19 = vsel %vm114_vm0, %v311_v18, 0.0  ;;  %v161_v33 = vmul.f32 %v311_v18, %v54_v29 }
 0x146   :  { %201 = vadd.xlane.f32.xlu0 %v200_v20  ;;  %198 = vadd.xlane.f32.xlu1 %v197_v19 }
 0x147   :  { %v176_v37 = vsel %vm114_vm0, %v161_v33, 0.0 }
 0x148   :  { %v313_v24 = vpop.eup %312 }
 0x149   :  { %v203_v25 = vsel %vm114_vm0, %v313_v24, 0.0  ;;  %v163_v40 = vmul.f32 %v313_v24, %v56_v36 }
 0x14a   :  { %165 = vadd.xlane.f32.xlu0 %v164_v26  ;;  %204 = vadd.xlane.f32.xlu1 %v203_v25 }
 0x14b   :  { %v182_v42 = vsel %vm114_vm0, %v163_v40, 0.0 }
 0x14e   :  { %171 = vadd.xlane.f32.xlu0 %v170_v31  ;;  %168 = vadd.xlane.f32.xlu1 %v167_v32 }
 0x152   :  { %177 = vadd.xlane.f32.xlu0 %v176_v37  ;;  %174 = vadd.xlane.f32.xlu1 %v173_v38 }
 0x156   :  { %180 = vadd.xlane.f32.xlu1 %v179_v41  ;;  %183 = vadd.xlane.f32.xlu0 %v182_v42 }
 0x1c7   :  { %v187_v43 = vpop.xlane.xlu1 %186 }
 0x1c8   :  { %314 = vrcp.f32 %v187_v43 }
 0x1cb   :  { %v190_v44 = vpop.xlane.xlu0 %189 }
 0x1cf   :  { %v193_v45 = vpop.xlane.xlu1 %192  ;;  %v196_v46 = vpop.xlane.xlu0 %195 }
 0x1d0   :  { %316 = vrcp.f32 %v193_v45 }
 0x1d1   :  { %318 = vrcp.f32 %v190_v44 }
 0x1d2   :  { %v315_v56 = vpop.eup %314 }
 0x1d3   :  { %v199_v48 = vpop.xlane.xlu1 %198  ;;  %v202_v49 = vpop.xlane.xlu0 %201 }
 0x1d4   :  { %320 = vrcp.f32 %v199_v48 }
 0x1d5   :  { %322 = vrcp.f32 %v196_v46 }
 0x1d7   :  { %v205_v53 = vpop.xlane.xlu1 %204  ;;  %v166_v54 = vpop.xlane.xlu0 %165 }
 0x1d8   :  { %324 = vrcp.f32 %v205_v53  ;;  %v213_v60 = vmul.f32 %v315_v56, %v166_v54 }
 0x1d9   :  { %326 = vrcp.f32 %v202_v49 }
 0x1da   :  { %v317_v58 = vpop.eup %316  ;;  %v232_v7 = vrot.slane %v213_v60, %v231_v59 }
 0x1db   :  { %v319_v62 = vpop.eup %318  ;;  %v169_v63 = vpop.xlane.xlu1 %168 }
 0x1dc   :  { %v172_v1 = vpop.xlane.xlu0 %171  ;;  %v214_v3 = vmul.f32 %v319_v62, %v169_v63 }
 0x1dd   :  { %v215_v4 = vmul.f32 %v317_v58, %v172_v1 }
 0x1de   :  { %v321_v6 = vpop.eup %320  ;;  %v237_v8 = vrot.slane %v214_v3, %v236_v61 }
 0x1df   :  { %v323_v11 = vpop.eup %322  ;;  %v244_v12 = vrot.slane %v215_v4, %v243_v0  ;;  %v175_v13 = vpop.xlane.xlu1 %174 }
 0x1e0   :  { %v178_v15 = vpop.xlane.xlu0 %177  ;;  %v239_v16 = vsel %vm238_vm1, %v237_v8, %v232_v7  ;;  %v216_v17 = vmul.f32 %v323_v11, %v175_v13 }
 0x1e1   :  { %v217_v18 = vmul.f32 %v321_v6, %v178_v15  ;;  %v246_v24 = vsel %vm245_vm2, %v244_v12, %v239_v16 }
 0x1e2   :  { %v325_v19 = vpop.eup %324  ;;  %v251_v20 = vrot.slane %v216_v17, %v250_v5 }
 0x1e3   :  { %v327_v23 = vpop.eup %326  ;;  %v258_v25 = vrot.slane %v217_v18, %v257_v14  ;;  %v181_v26 = vpop.xlane.xlu1 %180 }
 0x1e4   :  { %v184_v27 = vpop.xlane.xlu0 %183  ;;  %v253_v28 = vsel %vm252_vm3, %v251_v20, %v246_v24  ;;  %v218_v29 = vmul.f32 %v327_v23, %v181_v26 }
 0x1e5   :  { %v219_v30 = vmul.f32 %v325_v19, %v184_v27  ;;  %v260_v33 = vsel %vm259_vm4, %v258_v25, %v253_v28 }
 0x1e6   :  { %v265_v31 = vrot.slane %v218_v29, %v264_v21 }
 0x1e7   :  { %v272_v32 = vrot.slane %v219_v30, %v271_v22 }
 0x1e8   :  { %v267_v34 = vsel %vm266_vm5, %v265_v31, %v260_v33 }
 0x1e9   :  { %v274_v35 = vsel %vm273_vm6, %v272_v32, %v267_v34 }
 0x1ea   :  { %277 = vst.msk [vmem:[#allocation6] sm:$0x1] %vm276_vm7, %v274_v35 }
 0x1eb   :  { %361 = shalt.err (!%p358_p12)
}
 0x1ec   :  { %s362_s12 = scalar_lea.hbm %s503_s4, 16 }
 0x1ed   :  { %p363_p13 = scmp.ne.s32.totalorder %s503_s4, %s362_s12  ;;  %p366_p0 = scmp.lt.u32.totalorder %s362_s12, %s503_s4 }
 0x1ef   :  { %p368_p1 = pnand %p366_p0, %p363_p13 }
 0x1f1   :  { %371 = shalt.err (!%p368_p1)
}
 0x1f2   :  { %287 = dma.vmem_to_hbm [thread:$0]  %s285_s8, 16, %s503_s4, [#allocation5]  }
 0x1f3   :  { %374 = dma.done.wait [#allocation5], 16  }
 0x1f4   :  { %375 = vsyncadd [#allocation5], 4294967280 }
 0x1f5   :  { %291 = vsyncpa [#allocation4], 1 }
 0x1f6   :  { %292 = vsyncpa [#allocation5], 1 }

</bundles_post_ra>
